<compile_context>
chip_gen: v7x
topology: tpu7x:2x2x1
jax: 0.10.0
libtpu: 0.0.40
codegen_flags: <defaults>
</compile_context>

<pallas_src>
import math
import functools

import jax
import jax.numpy as jnp
from jax import lax
from jax.experimental import pallas as pl
from jax.experimental.pallas import tpu as pltpu


def _round_up(x, m):
    return ((x + m - 1) // m) * m


def _sinusoidal_kernel(x_ref, table_ref, bias_ref, out_ref, *, k):
    # x_ref:     (TILE_ROWS, k)       f32  positions (k packed per output row)
    # table_ref: (k, LANE_W)          f32  block-diagonal freq table:
    #                                      table[j, j*dim + d] = freqs_full[d]
    # bias_ref:  (1, LANE_W)          f32  0 for sin lanes, pi/2 for cos lanes
    # out_ref:   (TILE_ROWS, LANE_W)
    x = x_ref[...]
    if k == 1:
        # table is just freqs_full as a (1, dim) row -> plain VPU broadcast.
        phase = x * table_ref[...] + bias_ref[...]
    else:
        # Lane expansion + frequency multiply fused in one tiny MXU matmul
        # (contracting dim k <= 32; the MXU is otherwise idle in this kernel).
        phase = jnp.dot(x, table_ref[...],
                        precision=lax.Precision.HIGHEST,
                        preferred_element_type=jnp.float32) + bias_ref[...]
    # cos(t) == sin(t + pi/2): one full-width sin, one unmasked full-tile store.
    out_ref[...] = jnp.sin(phase).astype(out_ref.dtype)


def sinusoidal_pos_emb(x, dim, theta=10000, *, tile_n=2048, out_dtype=jnp.float32):
    """x: (N,) positions -> (N, dim) sinusoidal embedding (sin | cos halves)."""
    assert dim % 2 == 0, "dim must be even"
    assert dim >= 4, "dim must be >= 4 (half_dim == 1 divides by zero, as in the reference)"
    half_dim = dim // 2
    n = x.shape[0]

    # Lane packing: put k = 128 // dim positions side by side on the 128-lane
    # axis so every output store is a full, unmasked 128-lane vst.
    if dim < 128 and 128 % dim == 0:
        k = 128 // dim
    else:
        k = 1                      # dim >= 128 (or awkward dim): no packing
    lane_w = k * dim

    # Row tiling: multiples of 8 sublanes; big tiles (per-step overhead ~0.35us,
    # per-block VMEM is tiny even at tile_rows=2048).
    rows_needed = -(-n // k)
    tile_rows = max(8, _round_up(max(int(tile_n), 1), 8 * k) // k)
    tile_rows = min(tile_rows, _round_up(rows_needed, 8))
    if rows_needed >= 16:
        # Keep >= 2 grid steps so the "parallel" axis can shard across v7x's
        # two TensorCores and pipeline the writeback DMA on v5e/v6e.
        tile_rows = min(tile_rows, _round_up(-(-rows_needed // 2), 8))
    rows_pad = _round_up(rows_needed, tile_rows)
    n_pad = rows_pad * k

    xf = x.astype(jnp.float32).reshape(n)
    if n_pad != n:
        xf = jnp.pad(xf, (0, n_pad - n))
    x2d = xf.reshape(rows_pad, k)

    # Compile-time-constant tables, hoisted out of the kernel.
    scale = -math.log(theta) / (half_dim - 1)
    freqs = jnp.exp(jnp.arange(half_dim, dtype=jnp.float32) * scale)        # (half_dim,)
    freqs_full = jnp.concatenate([freqs, freqs])                            # (dim,)
    bias_row = jnp.concatenate(
        [jnp.zeros((half_dim,), jnp.float32),
         jnp.full((half_dim,), 0.5 * math.pi, dtype=jnp.float32)])          # (dim,)
    if k == 1:
        table = freqs_full.reshape(1, dim)
    else:
        eye = jnp.eye(k, dtype=jnp.float32)
        table = (eye[:, :, None] * freqs_full[None, None, :]).reshape(k, lane_w)
    bias = jnp.tile(bias_row, k).reshape(1, lane_w)

    kernel = functools.partial(_sinusoidal_kernel, k=k)
    grid = (rows_pad // tile_rows,)

    out2d = pl.pallas_call(
        kernel,
        out_shape=jax.ShapeDtypeStruct((rows_pad, lane_w), out_dtype),
        grid=grid,
        in_specs=[
            pl.BlockSpec((tile_rows, k), lambda i: (i, 0)),        # positions
            pl.BlockSpec((k, lane_w), lambda i: (0, 0)),           # freq table (const)
            pl.BlockSpec((1, lane_w), lambda i: (0, 0)),           # sin/cos bias (const)
        ],
        out_specs=pl.BlockSpec((tile_rows, lane_w), lambda i: (i, 0)),
        compiler_params=pltpu.CompilerParams(
            dimension_semantics=("parallel",),                     # megacore-shard N
        ),
    )(x2d, table, bias)

    # (rows_pad, k*dim) -> (n_pad, dim) is a free row-major reshape.
    out = out2d.reshape(n_pad, dim)
    if n_pad != n:
        # TODO(synk): a masked store on the last tile would avoid this extra
        # HBM slice copy; it only triggers when n is not tile-aligned.
        out = out[:n]
    return out


def _reference(x, dim, theta=10000):
    half_dim = dim // 2
    emb = math.log(theta) / (half_dim - 1)
    emb = jnp.exp(jnp.arange(half_dim, dtype=jnp.float32) * -emb)
    emb = x[:, None].astype(jnp.float32) * emb[None, :]
    return jnp.concatenate([jnp.sin(emb), jnp.cos(emb)], axis=-1)


if __name__ == "__main__":
    # cos is computed as sin(x + pi/2); difference vs an explicit cos is
    # O(ulp(phase)), so the tolerance scales with the position magnitude.
    TOL = dict(atol=3e-4, rtol=1e-4)

    # Diffusion-timestep-sized case: dim=32 -> k=4 positions packed per 128-lane row.
    x1 = jax.random.uniform(jax.random.PRNGKey(0), (8,), jnp.float32, 0.0, 100.0)
    o1 = jax.block_until_ready(sinusoidal_pos_emb(x1, 32, theta=10000))
    r1 = _reference(x1, 32)
    assert o1.shape == (8, 32), o1.shape
    assert jnp.allclose(o1, r1, **TOL), float(jnp.max(jnp.abs(o1 - r1)))

    # Non-tile-aligned N, dim=64 -> k=2, grid has 2 parallel steps.
    x2 = jax.random.uniform(jax.random.PRNGKey(1), (200,), jnp.float32, 0.0, 1000.0)
    o2 = jax.block_until_ready(sinusoidal_pos_emb(x2, 64, theta=10000))
    r2 = _reference(x2, 64)
    assert o2.shape == (200, 64), o2.shape
    assert jnp.allclose(o2, r2, **TOL), float(jnp.max(jnp.abs(o2 - r2)))

    # dim >= 128 (k = 1 fallback, already lane-dense, no packing, no trailing slice).
    x3 = jax.random.uniform(jax.random.PRNGKey(2), (64,), jnp.float32, 0.0, 1000.0)
    o3 = jax.block_until_ready(sinusoidal_pos_emb(x3, 256, theta=10000))
    r3 = _reference(x3, 256)
    assert o3.shape == (64, 256), o3.shape
    assert jnp.allclose(o3, r3, **TOL), float(jnp.max(jnp.abs(o3 - r3)))

    # Awkward dim (96 does not divide 128): fused-sin fallback path.
    x4 = jax.random.uniform(jax.random.PRNGKey(3), (40,), jnp.float32, 0.0, 500.0)
    o4 = jax.block_until_ready(sinusoidal_pos_emb(x4, 96, theta=10000))
    r4 = _reference(x4, 96)
    assert o4.shape == (40, 96), o4.shape
    assert jnp.allclose(o4, r4, **TOL), float(jnp.max(jnp.abs(o4 - r4)))

    print("KERNEL_OK")
</pallas_src>

<mosaic_0001>
module attributes {stable_mosaic.version = 11 : i64} {
  func.func @_sinusoidal_kernel(%arg0: i32, %arg1: memref<8x4xf32, #tpu.memory_space<vmem>>, %arg2: memref<4x128xf32, #tpu.memory_space<vmem>>, %arg3: memref<1x128xf32, #tpu.memory_space<vmem>>, %arg4: memref<8x128xf32, #tpu.memory_space<vmem>>) attributes {dimension_semantics = [#tpu.dimension_semantics<parallel>], iteration_bounds = array<i64: 1>, scalar_prefetch = 0 : i64, scratch_operands = 0 : i64, tpu.core_type = #tpu.core_type<tc>, window_params = [{transform_indices = @transform_0, window_bounds = array<i64: 8, 4>}, {pipeline_mode = #tpu.pipeline_mode<synchronous>, transform_indices = @transform_1, window_bounds = array<i64: 4, 128>}, {pipeline_mode = #tpu.pipeline_mode<synchronous>, transform_indices = @transform_2, window_bounds = array<i64: 1, 128>}, {transform_indices = @transform_3, window_bounds = array<i64: 8, 128>}]} {
    %c0 = arith.constant 0 : index
    %c0_0 = arith.constant 0 : index
    %0 = vector.load %arg1[%c0, %c0_0] : memref<8x4xf32, #tpu.memory_space<vmem>>, vector<8x4xf32>
    %c0_1 = arith.constant 0 : index
    %c0_2 = arith.constant 0 : index
    %1 = vector.load %arg2[%c0_1, %c0_2] : memref<4x128xf32, #tpu.memory_space<vmem>>, vector<4x128xf32>
    %cst = arith.constant dense<0.000000e+00> : vector<8x128xf32>
    %2 = tpu.matmul %0, %1, %cst {dimension_numbers = #tpu.dot_dimension_numbers<[1], [0], [0], [1], [0, 0, 1, 1], [], []>, precision = #tpu.contract_precision<fp32>} : vector<8x4xf32>, vector<4x128xf32>, vector<8x128xf32> -> vector<8x128xf32>
    %c0_3 = arith.constant 0 : index
    %c0_4 = arith.constant 0 : index
    %3 = vector.load %arg3[%c0_3, %c0_4] : memref<1x128xf32, #tpu.memory_space<vmem>>, vector<1x128xf32>
    %4 = vector.broadcast %3 : vector<1x128xf32> to vector<8x128xf32>
    %5 = arith.addf %2, %4 : vector<8x128xf32>
    %6 = math.sin %5 : vector<8x128xf32>
    %c0_5 = arith.constant 0 : index
    %c0_6 = arith.constant 0 : index
    %7 = vector.load %arg4[%c0_5, %c0_6] : memref<8x128xf32, #tpu.memory_space<vmem>>, vector<8x128xf32>
    tpu.vector_store %arg4[%c0_5, %c0_6], %6 {strides = array<i32>} : memref<8x128xf32, #tpu.memory_space<vmem>>, vector<8x128xf32>,
    return
  }
  func.func @transform_0(%arg0: i32) -> (i32, i32) {
    %c0_i32 = arith.constant 0 : i32
    %c0_i32_0 = arith.constant 0 : i32
    return %arg0, %c0_i32 : i32, i32
  }
  func.func @transform_1(%arg0: i32) -> (i32, i32) {
    %c0_i32 = arith.constant 0 : i32
    %c0_i32_0 = arith.constant 0 : i32
    %c0_i32_1 = arith.constant 0 : i32
    return %c0_i32, %c0_i32_0 : i32, i32
  }
  func.func @transform_2(%arg0: i32) -> (i32, i32) {
    %c0_i32 = arith.constant 0 : i32
    %c0_i32_0 = arith.constant 0 : i32
    %c0_i32_1 = arith.constant 0 : i32
    return %c0_i32, %c0_i32_0 : i32, i32
  }
  func.func @transform_3(%arg0: i32) -> (i32, i32) {
    %c0_i32 = arith.constant 0 : i32
    %c0_i32_0 = arith.constant 0 : i32
    return %arg0, %c0_i32 : i32, i32
  }
}

</mosaic_0001>

<bundles_post_ra>
// kernel: tpu_custom_call.1
= control target key start
LH: loop header
LB: loop body
LE: loop exit
PB: predicated region body
PF: predicated region fallthrough
CT: control target
= control target key end

     0   :  { %vm28_vm0 = vcmask 1043456   ;;  %v695_v2 = vmov 0.0   ;;  %vm696_vm1 = vmmov 0   ;;  %vm24_vm2 = vcmask 31744   ;;  %s772_s0 = inlined_call_operand.vmem [shape: f32[8,4], index: 0, kind: input, shape index: {}]   ;;  %s773_s1 = inlined_call_operand.vmem [shape: f32[4,128], index: 1, kind: input, shape index: {}]   ;;  %s774_s2 = inlined_call_operand.vmem [shape: f32[1,128], index: 2, kind: input, shape index: {}]   ;;  %s775_s3 = inlined_call_operand.hbm [shape: f32[8,128], index: 3, kind: output, shape index: {}]  }
   0x1   :  { %v16_v0 = vld [vmem:[%s773_s1] sm:$0xf]  ;;  %629 = vmatprep.subr.mxu0 %v695_v2  ;;  %631 = vmatprep.mubr.msk.f32.mxu0 %vm696_vm1, %v695_v2 }
   0x2   :  { %v15_v1 = vld [vmem:[%s772_s0] sm:$0xff]  ;;  %v30_v3 = vsel %vm28_vm0, %v16_v0, 0 }
   0x3   :  { %8 = vsyncpa [#allocation3], 0  ;;  %v33_v4 = vand.u32 4294901760, %v30_v3  ;;  %v26_v5 = vsel %vm24_vm2, %v15_v1, 0  ;;  %614 = vmatprep.subr.mxu1 %v695_v2  ;;  %616 = vmatprep.mubr.msk.f32.mxu1 %vm696_vm1, %v695_v2  ;;  %v597_v17 = vld [vmem:[%s774_s2] ss:$0 sm:$0xff] }
   0x4   :  { %v98_v6 = vand.u32 4294901760, %v26_v5  ;;  %v697_v33 = vmov 2102212464   ;;  %v698_v35 = vmov 920167782   ;;  %s703_s2 = smov [#allocation2]  }
   0x5   :  { %v110_v7 = vsub.f32 %v30_v3, %v33_v4  ;;  %630 = vmatpush3.msra.mxu0 %v33_v4  ;;  %615 = vmatpush3.msra.mxu1 %v33_v4  ;;  %v699_v39 = vmov 1326507024   ;;  %v700_v41 = vmov 683565275   ;;  %v701_v43 = vmov 2475754826  }
   0x6   :  { %v99_v8 = vsub.f32 %v26_v5, %v98_v6  ;;  %619 = vmatprep.subr.mxu1 %v695_v2  ;;  %634 = vmatprep.subr.mxu0 %v695_v2  ;;  %v702_v46 = vmov 2131351028   ;;  %s589_s16 = sshll.u32 %s703_s2, 4  ;;  %s590_s16 = int_to_ptr.vmem [resolvable:$true] %s589_s16 }
   0x7   :  { %v111_v9 = vand.u32 4294901760, %v110_v7  ;;  %s671_s17 = scalar_lea.vmem %s590_s16, 128  ;;  %p676_p1 = scmp.lt.s32.totalorder %s590_s16, %s590_s16 }
   0x8   :  { %v100_v10 = vand.u32 4294901760, %v99_v8  ;;  %p672_p0 = scmp.ne.s32.totalorder %s590_s16, %s671_s17  ;;  %p677_p2 = scmp.lt.s32.totalorder %s671_s17, %s671_s17 }
   0x9   :  { %v112_v11 = vsub.f32 %v110_v7, %v111_v9 }
   0xa   :  { %632 = vmatmul.mubr.f32.vlgmr.msra.gmra.mrb[0].mxu0 %v100_v10  ;;  %v101_v12 = vsub.f32 %v99_v8, %v100_v10  ;;  %p678_p3 = por %p677_p2, %p676_p1 }
   0xb   :  { %v113_v13 = vand.u32 4294901760, %v112_v11  ;;  %635 = vmatpush3.msra.mxu0 %v111_v9  ;;  %636 = vmatprep.mubr.msk.f32.mxu0 %vm696_vm1, %v695_v2 }
   0xc   :  { %v102_v14 = vand.u32 4294901760, %v101_v12  ;;  %639 = vmatprep.subr.mxu0 %v695_v2  ;;  %p679_p4 = pnand %p678_p3, %p672_p0 }
   0xe   :  { %617 = vmatmul.mubr.f32.vlgmr.msra.gmra.mrb[0].mxu1 %v102_v14 }
   0xf   :  { %620 = vmatpush3.msra.mxu1 %v113_v13  ;;  %621 = vmatprep.mubr.msk.f32.mxu1 %vm696_vm1, %v695_v2 }
  0x10   :  { %624 = vmatprep.subr.mxu1 %v695_v2 }
  0x12   :  { %637 = vmatmul.mubr.f32.vlgmr.msra.gmra.mrb[0].mxu0 %v98_v6 }
  0x13   :  { %640 = vmatpush3.msra.mxu0 %v33_v4  ;;  %641 = vmatprep.mubr.msk.f32.mxu0 %vm696_vm1, %v695_v2 }
  0x16   :  { %622 = vmatmul.mubr.f32.vlgmr.msra.gmra.mrb[0].mxu1 %v98_v6 }
  0x17   :  { %625 = vmatpush3.msra.mxu1 %v110_v7  ;;  %626 = vmatprep.mubr.msk.f32.mxu1 %vm696_vm1, %v695_v2 }
  0x1a   :  { %642 = vmatmul.mubr.f32.vlgmr.msra.gmra.mrb[0].mxu0 %v98_v6 }
  0x1e   :  { %627 = vmatmul.mubr.f32.vlgmr.msra.gmra.mrb[0].mxu1 %v99_v8 }
  0xed   :  { %v474_v15 = vpop.f32.mrb[0].mxu0 }
  0xee   :  { %v643_v16 = vpop.f32.mrb[1].mxu0 }
  0xf1   :  { %v254_v18 = vpop.f32.mrb[0].mxu1 }
  0xf2   :  { %v644_v19 = vadd.f32 %v597_v17, %v254_v18  ;;  %v628_v20 = vpop.f32.mrb[1].mxu1 }
  0xf4   :  { %v739_v21 = vadd.f32 %v644_v19, %v474_v15 }
  0xf6   :  { %v481_v22 = vand.u32 2139095040, %v739_v21  ;;  %v478_v23 = vand.u32 2147483647, %v739_v21  ;;  %vm480_vm10 = vcmp.lt.s32.totalorder %v739_v21, 0  ;;  %vm570_vm15 = vweird.f32 %v739_v21 }
  0xf8   :  { %v482_v24 = vshrl.u32 %v481_v22, 23  ;;  %v485_v26 = vand.u32 8388607, %v478_v23  ;;  %vm479_vm11 = vcmp.le.f32.partialorder %v478_v23, 0.7853982 }
  0xfa   :  { %v598_v25 = vadd.s32 4294967169, %v482_v24  ;;  %v486_v29 = vor.u32 8388608, %v485_v26 }
  0xfc   :  { %v488_v27 = vadd.s32 1, %v598_v25  ;;  %v526_v37 = vshll.u32 %v486_v29, 8 }
  0xfe   :  { %vm489_vm3 = vcmp.gt.s32.totalorder %v488_v27, 0 }
  0xff   :  { %v490_v28 = vsel %vm489_vm3, %v488_v27, 0 }
 0x100   :  { %v492_v30 = vand.u32 31, %v490_v28  ;;  %v491_v31 = vshrl.u32 %v490_v28, 5 }
 0x102   :  { %v493_v32 = vsub.s32 32, %v492_v30  ;;  %v504_v34 = vshll.u32 %v697_v33, %v492_v30  ;;  %v507_v36 = vshll.u32 %v698_v35, %v492_v30  ;;  %v495_v42 = vshll.u32 %v700_v41, %v492_v30 }
 0x103   :  { %v498_v45 = vshll.u32 %v701_v43, %v492_v30  ;;  %v501_v48 = vshll.u32 %v702_v46, %v492_v30  ;;  %vm513_vm4 = vcmp.lt.s32.totalorder %v491_v31, 4  ;;  %vm510_vm5 = vcmp.lt.s32.totalorder %v491_v31, 1 }
 0x104   :  { %v505_v38 = vshrl.u32 %v698_v35, %v493_v32  ;;  %v508_v40 = vshrl.u32 %v699_v39, %v493_v32  ;;  %v496_v44 = vshrl.u32 %v701_v43, %v493_v32  ;;  %v499_v47 = vshrl.u32 %v702_v46, %v493_v32 }
 0x105   :  { %v502_v49 = vshrl.u32 %v697_v33, %v493_v32  ;;  %v494_v53 = vshrl.u32 %v700_v41, %v493_v32  ;;  %vm511_vm6 = vcmp.lt.s32.totalorder %v491_v31, 2  ;;  %vm512_vm7 = vcmp.lt.s32.totalorder %v491_v31, 3 }
 0x106   :  { %v506_v50 = vor.u32 %v505_v38, %v504_v34  ;;  %v509_v51 = vor.u32 %v508_v40, %v507_v36  ;;  %v497_v52 = vor.u32 %v496_v44, %v495_v42  ;;  %v500_v54 = vor.u32 %v499_v47, %v498_v45 }
 0x107   :  { %v503_v55 = vor.u32 %v502_v49, %v501_v48 }
 0x108   :  { %v519_v56 = vsel %vm513_vm4, %v506_v50, 920167782  ;;  %v523_v57 = vsel %vm513_vm4, %v509_v51, 1326507024  ;;  %v518_v59 = vsel %vm510_vm5, %v497_v52, %v500_v54  ;;  %v514_v62 = vsel %vm510_vm5, %v494_v53, %v497_v52 }
 0x109   :  { %v515_v58 = vsel %vm513_vm4, %v503_v55, 2102212464  ;;  %v520_v60 = vsel %vm512_vm7, %v503_v55, %v519_v56  ;;  %v522_v61 = vsel %vm510_vm5, %v500_v54, %v503_v55  ;;  %v524_v1 = vsel %vm512_vm7, %v506_v50, %v523_v57 }
 0x10a   :  { %v516_v63 = vsel %vm512_vm7, %v500_v54, %v515_v58  ;;  %v521_v0 = vsel %vm511_vm6, %v518_v59, %v520_v60  ;;  %v525_v2 = vsel %vm511_vm6, %v522_v61, %v524_v1 }
 0x10b   :  { %v745_v3 = vmul.u32.u64.low %v526_v37, %v521_v0  ;;  %v746_v4 = vmul.u32.u64.high %v526_v37, %v521_v0, %v745_v3  ;;  %v748_v5 = vmul.u32.u64.low %v526_v37, %v525_v2  ;;  %v749_v6 = vmul.u32.u64.high %v526_v37, %v525_v2, %v748_v5 }
 0x10c   :  { %v517_v7 = vsel %vm511_vm6, %v514_v62, %v516_v63 }
 0x10d   :  { %v536_v8 = vadd.s32 1, %v746_v4  ;;  %v533_v9 = vmul.u32 %v526_v37, %v517_v7  ;;  %vm535_vm8 = vc.u32 %v749_v6, %v745_v3  ;;  %v534_v22 = vadd.s32 %v745_v3, %v749_v6 }
 0x10f   :  { %v537_v10 = vsel %vm535_vm8, %v536_v8, %v746_v4 }
 0x110   :  { %v538_v11 = vadd.s32 %v537_v10, %v533_v9 }
 0x112   :  { %v539_v12 = vadd.s32 536870912, %v538_v11 }
 0x114   :  { %v540_v13 = vshrl.u32 %v539_v12, 30 }
 0x116   :  { %v541_v14 = vshll.u32 %v540_v13, 30  ;;  %v564_v35 = vsub.s32 4, %v540_v13 }
 0x118   :  { %v542_v15 = vsub.s32 %v538_v11, %v541_v14  ;;  %v565_v38 = vsel %vm480_vm10, %v564_v35, %v540_v13 }
 0x119   :  { %v567_v40 = vsel %vm479_vm11, 0, %v565_v38 }
 0x11a   :  { %v544_v16 = vsub.s32 0, %v542_v15  ;;  %v571_v41 = vadd.s32 3, %v567_v40 }
 0x11c   :  { %v599_v17 = vmin.u32 %v544_v16, %v542_v15  ;;  %v572_v42 = vand.u32 3, %v571_v41 }
 0x11e   :  { %v546_v18 = vclz %v599_v17  ;;  %vm577_vm12 = vcmp.eq.s32.totalorder %v572_v42, 2  ;;  %vm574_vm13 = vcmp.eq.s32.totalorder %v572_v42, 0  ;;  %vm573_vm14 = vcmp.lt.s32.totalorder %v572_v42, 2 }
 0x120   :  { %v600_v19 = vadd.s32 4294967294, %v546_v18 }
 0x122   :  { %vm601_vm9 = vcmp.lt.s32.totalorder %v600_v19, 0 }
 0x123   :  { %v549_v20 = vsel %vm601_vm9, 0, %v600_v19 }
 0x124   :  { %v550_v24 = vsub.s32 32, %v549_v20  ;;  %v554_v25 = vsub.s32 4294967266, %v549_v20  ;;  %v551_v26 = vshll.u32 %v542_v15, %v549_v20 }
 0x126   :  { %v552_v27 = vshrl.u32 %v534_v22, %v550_v24  ;;  %v555_v28 = vadd.s32 127, %v554_v25 }
 0x128   :  { %v553_v29 = vor.u32 %v552_v27, %v551_v26  ;;  %v556_v30 = vshll.u32 %v555_v28, 23 }
 0x12a   :  { %v557_v31 = vor.u32 4788187, %v556_v30  ;;  %v560_v33 = vcvt.s32.f32 %v553_v29 }
 0x12c   :  { %v558_v32 = vand.u32 2147483647, %v557_v31 }
 0x12e   :  { %v561_v34 = vmul.f32 %v560_v33, %v558_v32 }
 0x130   :  { %v562_v36 = vxor.u32 2147483648, %v561_v34 }
 0x132   :  { %v563_v37 = vsel %vm480_vm10, %v562_v36, %v561_v34 }
 0x133   :  { %v566_v39 = vsel %vm479_vm11, %v739_v21, %v563_v37 }
 0x134   :  { %667 = vcosq.f32 %v566_v39 }
 0x135   :  { %669 = vsinq.f32 %v566_v39 }
 0x13e   :  { %v668_v43 = vpop.eup %667 }
 0x13f   :  { %v670_v44 = vpop.eup %669  ;;  %v578_v45 = vxor.u32 2147483648, %v668_v43 }
 0x140   :  { %v575_v46 = vxor.u32 2147483648, %v670_v44 }
 0x141   :  { %v579_v47 = vsel %vm577_vm12, %v578_v45, %v670_v44 }
 0x142   :  { %v576_v23 = vsel %vm574_vm13, %v668_v43, %v575_v46 }
 0x143   :  { %v580_v48 = vsel %vm573_vm14, %v576_v23, %v579_v47 }
 0x144   :  { %v581_v49 = vsel %vm570_vm15, nan, %v580_v48 }
 0x145   :  { %582 = vst [vmem:[#allocation2] sm:$0xff] %v581_v49 }
 0x146   :  { %682 = shalt.err (!%p679_p4)
}
 0x147   :  { %s683_s20 = scalar_lea.hbm %s775_s3, 128 }
 0x148   :  { %p684_p5 = scmp.ne.s32.totalorder %s775_s3, %s683_s20  ;;  %p687_p6 = scmp.lt.u32.totalorder %s683_s20, %s775_s3 }
 0x14a   :  { %p689_p7 = pnand %p687_p6, %p684_p5 }
 0x14c   :  { %692 = shalt.err (!%p689_p7)
}
 0x14d   :  { %592 = dma.vmem_to_hbm [thread:$0]  %s590_s16, 128, %s775_s3, [#allocation3]  }
 0x14e   :  { %693 = dma.done.wait [#allocation3], 128  }
 0x14f   :  { %694 = vsyncadd [#allocation3], 4294967168 }
 0x150   :  { %596 = vsyncpa [#allocation3], 1 }

</bundles_post_ra>
